<compile_context>
chip_gen: v7x
topology: tpu7x:2x2x1
jax: 0.10.0
libtpu: 0.0.40
codegen_flags: <defaults>
</compile_context>

<pallas_src>
import jax
import jax.numpy as jnp
from jax.experimental import pallas as pl
from jax.experimental.pallas import tpu as pltpu

LANES = 128
MAX_BLOCK_ROWS = 2048  # (2048, 128) f32 = 1 MiB per input buffer (4 MiB double-buffered)


def _cdiv(a, b):
    return -(-a // b)


def _make_kernel(n_valid, block_rows):
    block_elems = block_rows * LANES

    def kernel(pred_ref, true_ref, out_ref, acc_ref):
        c = pl.program_id(0)            # shard (TensorCore on v7x)
        j = pl.program_id(1)            # step within shard
        steps_per_shard = pl.num_programs(1)

        @pl.when(j == 0)
        def _():
            acc_ref[...] = jnp.zeros_like(acc_ref)

        p = pred_ref[...].astype(jnp.float32)
        t = true_ref[...].astype(jnp.float32)

        diff = p - t
        # coe = 0.1 + sigmoid(t * 80 / 15); exp and reciprocal go to the EUP slot.
        e = jnp.exp(t * jnp.float32(-80.0 / 15.0))
        coe = jnp.float32(0.1) + pl.reciprocal(jnp.float32(1.0) + e, approx=False)
        val = coe * diff * diff

        # Mask anything past the true element count: covers the lane-pad tail,
        # the partial last block, and any clamped (duplicated) overhang block.
        base = (c * steps_per_shard + j) * block_elems
        row = jax.lax.broadcasted_iota(jnp.int32, (block_rows, LANES), 0)
        lane = jax.lax.broadcasted_iota(jnp.int32, (block_rows, LANES), 1)
        elem = base + row * LANES + lane
        acc_ref[...] += jnp.where(elem < n_valid, val, jnp.float32(0.0))

        @pl.when(j == steps_per_shard - 1)
        def _():
            out_ref[0, 0] = jnp.sum(acc_ref[...])

    return kernel


@jax.jit
def fl_loss(pred, true):
    """Pallas TPU implementation of FLloss.forward(pred, true)."""
    n = pred.size
    pred_f = pred.reshape(-1)
    true_f = true.reshape(-1)

    rows = _cdiv(n, LANES)
    pad = rows * LANES - n
    if pad:  # only for ragged sizes; common n % 128 == 0 case skips this copy
        pred_f = jnp.pad(pred_f, (0, pad))
        true_f = jnp.pad(true_f, (0, pad))

    block_rows = rows if rows <= MAX_BLOCK_ROWS else MAX_BLOCK_ROWS
    steps = _cdiv(rows, block_rows)
    n_shards = 2 if steps >= 2 else 1            # one shard per TensorCore on v7x
    steps_per_shard = _cdiv(steps, n_shards)

    pred2d = pred_f.reshape(rows, LANES)
    true2d = true_f.reshape(rows, LANES)

    if n_shards * steps_per_shard == steps:
        in_map = lambda c, j: (c * steps_per_shard + j, 0)
    else:
        # Clamp the single overhanging block index; its contribution is masked to 0.
        in_map = lambda c, j: (jnp.minimum(c * steps_per_shard + j, steps - 1), 0)

    partials = pl.pallas_call(
        _make_kernel(n, block_rows),
        out_shape=jax.ShapeDtypeStruct((n_shards, 1), jnp.float32),
        grid_spec=pltpu.PrefetchScalarGridSpec(
            num_scalar_prefetch=0,
            grid=(n_shards, steps_per_shard),
            in_specs=[
                pl.BlockSpec((block_rows, LANES), in_map),
                pl.BlockSpec((block_rows, LANES), in_map),
            ],
            out_specs=pl.BlockSpec(
                (1, 1), lambda c, j: (c, 0), memory_space=pltpu.SMEM
            ),
            scratch_shapes=[pltpu.VMEM((block_rows, LANES), jnp.float32)],
        ),
        compiler_params=pltpu.CompilerParams(
            dimension_semantics=("parallel", "arbitrary"),
        ),
    )(pred2d, true2d)

    return jnp.sum(partials) / jnp.float32(n)


def fl_loss_ref(pred, true):
    tmp = jnp.square(pred - true)
    coe = 0.1 + 1.0 / (1.0 + jnp.exp(-true * 80.0 / 15.0))
    return jnp.mean(coe * tmp)


def _check(shape, key):
    k1, k2 = jax.random.split(key)
    pred = jax.random.normal(k1, shape, dtype=jnp.float32)
    true = jax.random.normal(k2, shape, dtype=jnp.float32)
    out = fl_loss(pred, true)
    jax.block_until_ready(out)
    ref = fl_loss_ref(pred, true)
    assert jnp.allclose(out, ref, rtol=5e-5, atol=1e-6), (shape, out, ref)


if __name__ == "__main__":
    key = jax.random.PRNGKey(0)
    keys = jax.random.split(key, 3)
    _check((2, 4, 16, 16), keys[0])      # module's test shape: single-block fast path
    _check((3, 5, 17, 19), keys[1])      # ragged size: lane-pad + in-kernel mask
    _check((1, 2, 2098, 128), keys[2])   # multi-block, 2 shards, partial + clamped block
    print("KERNEL_OK")
</pallas_src>

<mosaic_0001>
module attributes {stable_mosaic.version = 11 : i64} {
  func.func @kernel(%arg0: i32, %arg1: i32, %arg2: memref<16x128xf32, #tpu.memory_space<vmem>>, %arg3: memref<16x128xf32, #tpu.memory_space<vmem>>, %arg4: memref<1x1xf32, #tpu.memory_space<smem>>, %arg5: memref<16x128xf32, #tpu.memory_space<vmem>>) attributes {dimension_semantics = [#tpu.dimension_semantics<parallel>, #tpu.dimension_semantics<arbitrary>], iteration_bounds = array<i64: 1, 1>, scalar_prefetch = 0 : i64, scratch_operands = 1 : i64, tpu.core_type = #tpu.core_type<tc>, window_params = [{transform_indices = @transform_0, window_bounds = array<i64: 16, 128>}, {transform_indices = @transform_1, window_bounds = array<i64: 16, 128>}, {transform_indices = @transform_2, window_bounds = array<i64: 1, 1>}]} {
    %c0_i32 = arith.constant 0 : i32
    %0 = arith.cmpi eq, %arg1, %c0_i32 : i32
    %1 = arith.extui %0 : i1 to i32
    %c0_i32_0 = arith.constant 0 : i32
    %2 = arith.cmpi ne, %1, %c0_i32_0 : i32
    scf.if %2 {
      %cst_14 = arith.constant 0.000000e+00 : f32
      %36 = vector.broadcast %cst_14 : f32 to vector<16x128xf32>
      %c0_15 = arith.constant 0 : index
      %c0_16 = arith.constant 0 : index
      %37 = vector.load %arg5[%c0_15, %c0_16] : memref<16x128xf32, #tpu.memory_space<vmem>>, vector<16x128xf32>
      tpu.vector_store %arg5[%c0_15, %c0_16], %36 {strides = array<i32>} : memref<16x128xf32, #tpu.memory_space<vmem>>, vector<16x128xf32>,
    } else {
    }
    %c0 = arith.constant 0 : index
    %c0_1 = arith.constant 0 : index
    %3 = vector.load %arg2[%c0, %c0_1] : memref<16x128xf32, #tpu.memory_space<vmem>>, vector<16x128xf32>
    %c0_2 = arith.constant 0 : index
    %c0_3 = arith.constant 0 : index
    %4 = vector.load %arg3[%c0_2, %c0_3] : memref<16x128xf32, #tpu.memory_space<vmem>>, vector<16x128xf32>
    %5 = arith.subf %3, %4 : vector<16x128xf32>
    %cst = arith.constant -5.33333349 : f32
    %6 = vector.broadcast %cst : f32 to vector<16x128xf32>
    %7 = arith.mulf %4, %6 : vector<16x128xf32>
    %8 = math.exp %7 : vector<16x128xf32>
    %cst_4 = arith.constant 1.000000e+00 : f32
    %9 = vector.broadcast %cst_4 : f32 to vector<16x128xf32>
    %10 = arith.addf %9, %8 : vector<16x128xf32>
    %11 = tpu.reciprocal %10 : vector<16x128xf32> -> vector<16x128xf32>
    %cst_5 = arith.constant 1.000000e-01 : f32
    %12 = vector.broadcast %cst_5 : f32 to vector<16x128xf32>
    %13 = arith.addf %12, %11 : vector<16x128xf32>
    %14 = arith.mulf %13, %5 : vector<16x128xf32>
    %15 = arith.mulf %14, %5 : vector<16x128xf32>
    %c1_i32 = arith.constant 1 : i32
    %16 = arith.muli %arg0, %c1_i32 : i32
    %17 = arith.addi %16, %arg1 : i32
    %c2048_i32 = arith.constant 2048 : i32
    %18 = arith.muli %17, %c2048_i32 : i32
    %19 = tpu.iota {dimensions = array<i32: 0>} : vector<16x128xi32>
    %20 = tpu.iota {dimensions = array<i32: 1>} : vector<16x128xi32>
    %c128_i32 = arith.constant 128 : i32
    %21 = vector.broadcast %c128_i32 : i32 to vector<16x128xi32>
    %22 = arith.muli %19, %21 : vector<16x128xi32>
    %23 = vector.broadcast %18 : i32 to vector<16x128xi32>
    %24 = arith.addi %23, %22 : vector<16x128xi32>
    %25 = arith.addi %24, %20 : vector<16x128xi32>
    %c0_6 = arith.constant 0 : index
    %c0_7 = arith.constant 0 : index
    %26 = vector.load %arg5[%c0_6, %c0_7] : memref<16x128xf32, #tpu.memory_space<vmem>>, vector<16x128xf32>
    %c2048_i32_8 = arith.constant 2048 : i32
    %27 = vector.broadcast %c2048_i32_8 : i32 to vector<16x128xi32>
    %28 = arith.cmpi slt, %25, %27 : vector<16x128xi32>
    %cst_9 = arith.constant 0.000000e+00 : f32
    %29 = vector.broadcast %cst_9 : f32 to vector<16x128xf32>
    %30 = arith.select %28, %15, %29 : vector<16x128xi1>, vector<16x128xf32>
    %31 = arith.addf %26, %30 : vector<16x128xf32>
    %c0_10 = arith.constant 0 : index
    %c0_11 = arith.constant 0 : index
    %32 = vector.load %arg5[%c0_10, %c0_11] : memref<16x128xf32, #tpu.memory_space<vmem>>, vector<16x128xf32>
    tpu.vector_store %arg5[%c0_10, %c0_11], %31 {strides = array<i32>} : memref<16x128xf32, #tpu.memory_space<vmem>>, vector<16x128xf32>,
    %c0_i32_12 = arith.constant 0 : i32
    %33 = arith.cmpi eq, %arg1, %c0_i32_12 : i32
    %34 = arith.extui %33 : i1 to i32
    %c0_i32_13 = arith.constant 0 : i32
    %35 = arith.cmpi ne, %34, %c0_i32_13 : i32
    scf.if %35 {
      %c0_14 = arith.constant 0 : index
      %c0_15 = arith.constant 0 : index
      %36 = vector.load %arg5[%c0_14, %c0_15] : memref<16x128xf32, #tpu.memory_space<vmem>>, vector<16x128xf32>
      %37 = vector.shape_cast %36 : vector<16x128xf32> to vector<1x16x128xf32>
      %cst_16 = arith.constant dense<0.000000e+00> : vector<1xf32>
      %38 = vector.multi_reduction <add>, %37, %cst_16 [1, 2] : vector<1x16x128xf32> to vector<1xf32>
      %39 = vector.shape_cast %38 : vector<1xf32> to vector<1x1x1xf32>
      %40 = vector.extract %39[0, 0, 0] : f32 from vector<1x1x1xf32>
      %c0_17 = arith.constant 0 : index
      %c0_18 = arith.constant 0 : index
      %41 = memref.load %arg4[%c0_17, %c0_18] : memref<1x1xf32, #tpu.memory_space<smem>>
      memref.store %40, %arg4[%c0_17, %c0_18] : memref<1x1xf32, #tpu.memory_space<smem>>
    } else {
    }
    return
  }
  func.func @transform_0(%arg0: i32, %arg1: i32) -> (i32, i32) {
    %c1_i32 = arith.constant 1 : i32
    %0 = arith.muli %arg0, %c1_i32 : i32
    %1 = arith.addi %0, %arg1 : i32
    %c0_i32 = arith.constant 0 : i32
    %c0_i32_0 = arith.constant 0 : i32
    return %1, %c0_i32 : i32, i32
  }
  func.func @transform_1(%arg0: i32, %arg1: i32) -> (i32, i32) {
    %c1_i32 = arith.constant 1 : i32
    %0 = arith.muli %arg0, %c1_i32 : i32
    %1 = arith.addi %0, %arg1 : i32
    %c0_i32 = arith.constant 0 : i32
    %c0_i32_0 = arith.constant 0 : i32
    return %1, %c0_i32 : i32, i32
  }
  func.func @transform_2(%arg0: i32, %arg1: i32) -> (i32, i32) {
    %c0_i32 = arith.constant 0 : i32
    %c0_i32_0 = arith.constant 0 : i32
    return %arg0, %c0_i32 : i32, i32
  }
}

</mosaic_0001>

<bundles_post_ra>
// kernel: fl_loss.1
= control target key start
LH: loop header
LB: loop body
LE: loop exit
PB: predicated region body
PF: predicated region fallthrough
CT: control target
= control target key end

     0   :  { %s213_s0 = inlined_call_operand.vmem [shape: f32[16,128], index: 0, kind: input, shape index: {}]   ;;  %s214_s1 = inlined_call_operand.vmem [shape: f32[16,128], index: 1, kind: input, shape index: {}]   ;;  %s215_s2 = inlined_call_operand.hbm [shape: f32[1,1], index: 2, kind: output, shape index: {}]  }
   0x1   :  { %v64_v0 = vld [vmem:[%s214_s1] sm:$0xff]  ;;  %v65_v1 = vld [vmem:[%s214_s1 + $0x8] sm:$0xff] }
   0x2   :  { %v68_v2 = vmul.f32 -5.3333335, %v64_v0 }
   0x3   :  { %7 = vsyncpa [#allocation4], 0  ;;  %v69_v3 = vmul.f32 -5.3333335, %v65_v1  ;;  %v86_v6 = vlaneseq  ;;  %v62_v13 = vld [vmem:[%s213_s0] sm:$0xff]  ;;  %v63_v16 = vld [vmem:[%s213_s0 + $0x8] sm:$0xff] }
   0x4   :  { %v70_v4 = vmul.f32 1.442695, %v68_v2  ;;  %v66_v18 = vsub.f32 %v62_v13, %v64_v0  ;;  %v67_v20 = vsub.f32 %v63_v16, %v65_v1  ;;  %s161_s18 = scalar_lea.hbm %s215_s2, 16 }
   0x5   :  { %v72_v5 = vmul.f32 1.442695, %v69_v3  ;;  %v87_v11 = vshrl.u32 %v86_v6, 7  ;;  %v90_v14 = vand.u32 127, %v86_v6  ;;  %p162_p0 = scmp.ne.s32.totalorder %s215_s2, %s161_s18  ;;  %p165_p1 = scmp.lt.u32.totalorder %s161_s18, %s215_s2 }
   0x6   :  { %153 = vpow2.f32 %v70_v4 }
   0x7   :  { %155 = vpow2.f32 %v72_v5  ;;  %v88_v12 = vadd.s32 8, %v87_v11  ;;  %v91_v15 = vmul.u32 128, %v87_v11  ;;  %p167_p2 = pnand %p165_p1, %p162_p0 }
   0x9   :  { %v92_v17 = vmul.u32 128, %v88_v12  ;;  %v96_v21 = vadd.s32 %v91_v15, %v90_v14 }
   0xb   :  { %v97_v24 = vadd.s32 %v92_v17, %v90_v14  ;;  %vm100_vm0 = vcmp.lt.s32.totalorder %v96_v21, 2048 }
   0xd   :  { %vm101_vm1 = vcmp.lt.s32.totalorder %v97_v24, 2048 }
  0x10   :  { %v154_v7 = vpop.eup %153 }
  0x11   :  { %v156_v8 = vpop.eup %155  ;;  %v74_v9 = vadd.f32 1.0, %v154_v7 }
  0x12   :  { %v75_v10 = vadd.f32 1.0, %v156_v8 }
  0x13   :  { %157 = vrcp.f32 %v74_v9 }
  0x14   :  { %159 = vrcp.f32 %v75_v10 }
  0x1d   :  { %v158_v19 = vpop.eup %157 }
  0x1e   :  { %v160_v22 = vpop.eup %159  ;;  %v78_v23 = vadd.f32 0.1, %v158_v19 }
  0x1f   :  { %v79_v25 = vadd.f32 0.1, %v160_v22 }
  0x20   :  { %v80_v26 = vmul.f32 %v78_v23, %v66_v18 }
  0x21   :  { %v81_v27 = vmul.f32 %v79_v25, %v67_v20 }
  0x22   :  { %v82_v28 = vmul.f32 %v80_v26, %v66_v18 }
  0x23   :  { %v83_v29 = vmul.f32 %v81_v27, %v67_v20 }
  0x24   :  { %v102_v30 = vsel %vm100_vm0, %v82_v28, 0.0 }
  0x25   :  { %v103_v31 = vsel %vm101_vm1, %v83_v29, 0.0 }
  0x26   :  { %v113_v32 = vadd.f32 %v103_v31, %v102_v30 }
  0x28   :  { %114 = vadd.xlane.f32.xlu0 %v113_v32 }
  0xb5   :  { %v115_v33 = vpop.xlane.xlu0 %114 }
  0xb6   :  { %v116_v34 = vrot.slane %v115_v33, 4 }
  0xb8   :  { %v117_v35 = vadd.f32 %v116_v34, %v115_v33 }
  0xba   :  { %v118_v36 = vrot.slane %v117_v35, 2 }
  0xbc   :  { %v119_v37 = vadd.f32 %v118_v36, %v117_v35 }
  0xbe   :  { %v120_v38 = vrot.slane %v119_v37, 1 }
  0xc0   :  { %v121_v39 = vadd.f32 %v120_v38, %v119_v37 }
  0xc2   :  { %150 = vpush %v121_v39 }
  0xf3   :  { %s151_s0 = spop %150 }
  0xf4   :  { %124 = sst [smem:[#allocation3]] %s151_s0 }
  0xf5   :  { %170 = shalt.err (!%p167_p2)
}
  0xf6   :  { %s173_s23 = smov [#allocation3]  }
  0xf7   :  { %132 = dma.smem_to_hbm %s173_s23, 16, %s215_s2, [#allocation4]  }
  0xf8   :  { %171 = dma.done.wait [#allocation4], 16  }
  0xf9   :  { %172 = vsyncadd [#allocation4], 4294967280 }
  0xfa   :  { %136 = sfence }
  0xfb   :  { %137 = vsyncpa [#allocation4], 1 }

</bundles_post_ra>
